<compile_context>
chip_gen: v7x
topology: tpu7x:2x2x1
jax: 0.10.0
libtpu: 0.0.40
codegen_flags: <defaults>
</compile_context>

<pallas_src>
import jax
import jax.numpy as jnp
from jax.experimental import pallas as pl
from jax.experimental.pallas import tpu as pltpu


# ----------------------------- Pallas kernel -------------------------------
def _attention_block_kernel(g_ref, x_ref, wg_ref, bg_ref, wx_ref, bx_ref,
                            wpsi_ref, bpsi_ref, o_ref):
    # g_ref    : (F_g, T)   spatial tile of g  (channels on sublanes, space on lanes)
    # x_ref    : (F_l, T)   spatial tile of x
    # wg_ref   : (F_int, F_g)  folded W_g conv+BN weight (C_out, C_in)
    # bg_ref   : (F_int, 1)    folded W_g bias
    # wx_ref   : (F_int, F_l)  folded W_x conv+BN weight
    # bx_ref   : (F_int, 1)    folded W_x bias
    # wpsi_ref : (1, F_int)    folded psi conv+BN weight
    # bpsi_ref : (1, 1)        folded psi bias
    # o_ref    : (F_l, T)
    g = g_ref[...]          # native dtype straight into the MXU (f32 accumulate)
    x = x_ref[...]

    # g1 = BN(Conv1x1(g)),  x1 = BN(Conv1x1(x))   (BN folded into w/b)
    g1 = jnp.dot(wg_ref[...], g, preferred_element_type=jnp.float32) + bg_ref[...]
    x1 = jnp.dot(wx_ref[...], x, preferred_element_type=jnp.float32) + bx_ref[...]

    # relu(g1 + x1)
    h = jnp.maximum(g1 + x1, 0.0)                              # (F_int, T) f32

    # psi = sigmoid(BN(Conv1x1(h)))   -> (1, T)
    psi = jnp.dot(wpsi_ref[...], h, preferred_element_type=jnp.float32) + bpsi_ref[...]
    psi = jax.nn.sigmoid(psi)

    # out = x * psi   (broadcast over channels / sublanes), lane-dense store
    o_ref[...] = (x.astype(jnp.float32) * psi).astype(o_ref.dtype)


# ------------------------------ tiling helper -------------------------------
_LANE = 128
_VMEM_TILE_BUDGET = 6 * 1024 * 1024   # comfortably under every gen's scoped VMEM


def _choose_spatial_tile(hw, f_g, f_l, f_int, itemsize):
    """Largest lane tile T (multiple of 128) dividing the padded spatial dim."""
    hw_pad = pl.cdiv(hw, _LANE) * _LANE
    k = hw_pad // _LANE
    # rough per-lane-column VMEM cost: double-buffered in/out tiles + f32 temps
    per_col = 2 * (f_g + 2 * f_l) * itemsize + 3 * f_int * 4 + 16
    cap_cols = max(1, min(_VMEM_TILE_BUDGET // (per_col * _LANE), 32))  # <= 4096 lanes
    best = 1
    for c in range(1, k + 1):
        if k % c == 0 and c <= cap_cols:
            best = c
    return hw_pad, best * _LANE


# ------------------------------ wrapper ------------------------------------
@jax.jit
def attention_block(g_nchw, x_nchw, wg, bg, wx, bx, wpsi, bpsi):
    N, F_g, H, W = g_nchw.shape
    _, F_l, _, _ = x_nchw.shape
    F_int = wg.shape[0]
    HW = H * W

    itemsize = jnp.dtype(x_nchw.dtype).itemsize
    HWp, T = _choose_spatial_tile(HW, F_g, F_l, F_int, itemsize)

    # Free reshape: NCHW -> (N, C, H*W).  No transposes anywhere.
    g3 = g_nchw.reshape(N, F_g, HW)
    x3 = x_nchw.reshape(N, F_l, HW)
    if HWp != HW:
        pad = ((0, 0), (0, 0), (0, HWp - HW))
        g3 = jnp.pad(g3, pad)
        x3 = jnp.pad(x3, pad)

    bg2 = bg.reshape(F_int, 1)
    bx2 = bx.reshape(F_int, 1)
    bpsi2 = bpsi.reshape(1, 1)

    grid = (N, HWp // T)

    out3 = pl.pallas_call(
        _attention_block_kernel,
        out_shape=jax.ShapeDtypeStruct((N, F_l, HWp), x_nchw.dtype),
        grid_spec=pltpu.PrefetchScalarGridSpec(
            num_scalar_prefetch=0,
            grid=grid,
            in_specs=[
                pl.BlockSpec((None, F_g, T), lambda n, t: (n, 0, t)),   # g tile
                pl.BlockSpec((None, F_l, T), lambda n, t: (n, 0, t)),   # x tile
                pl.BlockSpec((F_int, F_g),   lambda n, t: (0, 0)),      # wg
                pl.BlockSpec((F_int, 1),     lambda n, t: (0, 0)),      # bg
                pl.BlockSpec((F_int, F_l),   lambda n, t: (0, 0)),      # wx
                pl.BlockSpec((F_int, 1),     lambda n, t: (0, 0)),      # bx
                pl.BlockSpec((1, F_int),     lambda n, t: (0, 0)),      # wpsi
                pl.BlockSpec((1, 1),         lambda n, t: (0, 0)),      # bpsi
            ],
            out_specs=pl.BlockSpec((None, F_l, T), lambda n, t: (n, 0, t)),
        ),
        compiler_params=pltpu.CompilerParams(
            dimension_semantics=("parallel", "parallel")),
    )(g3, x3, wg, bg2, wx, bx2, wpsi, bpsi2)

    if HWp != HW:
        out3 = out3[:, :, :HW]
    return out3.reshape(N, F_l, H, W)


# --------------------- deterministic parameter setup -----------------------
def make_params(key, F_g, F_l, F_int, eps=1e-5):
    """Build conv + BN params (PyTorch layout) and fold BN (eval mode) into them."""
    ks = jax.random.split(key, 6)

    def conv_params(kw, kb, c_out, c_in):
        # PyTorch Conv2d weight: (C_out, C_in, 1, 1); bias: (C_out,)
        w = 0.1 * jax.random.normal(kw, (c_out, c_in, 1, 1), jnp.float32)
        b = 0.1 * jax.random.normal(kb, (c_out,), jnp.float32)
        return w, b

    def bn_params(c, offset):
        # deterministic (non-trivial) BN eval-mode params
        gamma = 1.0 + 0.1 * jnp.arange(c, dtype=jnp.float32) / max(c, 1)
        beta = 0.05 * jnp.ones((c,), jnp.float32)
        mean = 0.02 * jnp.arange(c, dtype=jnp.float32) + offset
        var = 1.0 + 0.01 * jnp.arange(c, dtype=jnp.float32)
        return gamma, beta, mean, var

    def fold(w, b, gamma, beta, mean, var):
        # y = ((x conv w + b) - mean)/sqrt(var+eps)*gamma + beta
        scale = gamma / jnp.sqrt(var + eps)          # (C_out,)
        w2 = w[:, :, 0, 0] * scale[:, None]          # (C_out, C_in)  <- kernel layout
        b2 = (b - mean) * scale + beta               # (C_out,)
        return w2, b2

    wg_raw, bg_raw = conv_params(ks[0], ks[1], F_int, F_g)
    wx_raw, bx_raw = conv_params(ks[2], ks[3], F_int, F_l)
    wp_raw, bp_raw = conv_params(ks[4], ks[5], 1, F_int)

    wg, bg = fold(wg_raw, bg_raw, *bn_params(F_int, 0.0))
    wx, bx = fold(wx_raw, bx_raw, *bn_params(F_int, 0.01))
    wpsi, bpsi = fold(wp_raw, bp_raw, *bn_params(1, 0.0))
    return wg, bg, wx, bx, wpsi, bpsi


# ---------------------- pure-JAX reference (sanity) ------------------------
def attention_block_ref(g_nchw, x_nchw, wg, bg, wx, bx, wpsi, bpsi):
    N, F_g, H, W = g_nchw.shape
    _, F_l, _, _ = x_nchw.shape
    g2 = jnp.transpose(g_nchw, (0, 2, 3, 1)).reshape(-1, F_g)
    x2 = jnp.transpose(x_nchw, (0, 2, 3, 1)).reshape(-1, F_l)
    g1 = g2 @ wg.T + bg
    x1 = x2 @ wx.T + bx
    h = jnp.maximum(g1 + x1, 0.0)
    psi = jax.nn.sigmoid(h @ wpsi.T + bpsi.reshape(1, 1))
    out2 = x2 * psi
    return jnp.transpose(out2.reshape(N, H, W, F_l), (0, 3, 1, 2))


if __name__ == "__main__":
    F_g, F_l, F_int = 4, 4, 32
    N, H, W = 2, 16, 16

    key = jax.random.PRNGKey(0)
    kg, kx, kp = jax.random.split(key, 3)
    g = jax.random.normal(kg, (N, F_g, H, W), jnp.float32)
    x = jax.random.normal(kx, (N, F_l, H, W), jnp.float32)

    wg, bg, wx, bx, wpsi, bpsi = make_params(kp, F_g, F_l, F_int)

    out = attention_block(g, x, wg, bg, wx, bx, wpsi, bpsi)
    out = jax.block_until_ready(out)

    ref = attention_block_ref(g, x, wg, bg, wx, bx, wpsi, bpsi)
    assert out.shape == (N, F_l, H, W)
    assert jnp.allclose(out, ref, atol=2e-5, rtol=2e-5)

    print("KERNEL_OK")
</pallas_src>

<mosaic_0001>
module attributes {stable_mosaic.version = 11 : i64} {
  func.func @_attention_block_kernel(%arg0: i32, %arg1: i32, %arg2: memref<1x4x256xf32, #tpu.memory_space<vmem>>, %arg3: memref<1x4x256xf32, #tpu.memory_space<vmem>>, %arg4: memref<32x4xf32, #tpu.memory_space<vmem>>, %arg5: memref<32x1xf32, #tpu.memory_space<vmem>>, %arg6: memref<32x4xf32, #tpu.memory_space<vmem>>, %arg7: memref<32x1xf32, #tpu.memory_space<vmem>>, %arg8: memref<1x32xf32, #tpu.memory_space<vmem>>, %arg9: memref<1x1xf32, #tpu.memory_space<vmem>>, %arg10: memref<1x4x256xf32, #tpu.memory_space<vmem>>) attributes {dimension_semantics = [#tpu.dimension_semantics<parallel>, #tpu.dimension_semantics<parallel>], iteration_bounds = array<i64: 2, 1>, scalar_prefetch = 0 : i64, scratch_operands = 0 : i64, tpu.core_type = #tpu.core_type<tc>, window_params = [{transform_indices = @transform_0, window_bounds = array<i64: 1, 4, 256>}, {transform_indices = @transform_1, window_bounds = array<i64: 1, 4, 256>}, {pipeline_mode = #tpu.pipeline_mode<synchronous>, transform_indices = @transform_2, window_bounds = array<i64: 32, 4>}, {pipeline_mode = #tpu.pipeline_mode<synchronous>, transform_indices = @transform_3, window_bounds = array<i64: 32, 1>}, {pipeline_mode = #tpu.pipeline_mode<synchronous>, transform_indices = @transform_4, window_bounds = array<i64: 32, 4>}, {pipeline_mode = #tpu.pipeline_mode<synchronous>, transform_indices = @transform_5, window_bounds = array<i64: 32, 1>}, {pipeline_mode = #tpu.pipeline_mode<synchronous>, transform_indices = @transform_6, window_bounds = array<i64: 1, 32>}, {pipeline_mode = #tpu.pipeline_mode<synchronous>, transform_indices = @transform_7, window_bounds = array<i64: 1, 1>}, {transform_indices = @transform_8, window_bounds = array<i64: 1, 4, 256>}]} {
    %c0 = arith.constant 0 : index
    %c0_0 = arith.constant 0 : index
    %c0_1 = arith.constant 0 : index
    %0 = vector.load %arg2[%c0, %c0_0, %c0_1] : memref<1x4x256xf32, #tpu.memory_space<vmem>>, vector<1x4x256xf32>
    %1 = vector.shape_cast %0 : vector<1x4x256xf32> to vector<4x256xf32>
    %c0_2 = arith.constant 0 : index
    %c0_3 = arith.constant 0 : index
    %c0_4 = arith.constant 0 : index
    %2 = vector.load %arg3[%c0_2, %c0_3, %c0_4] : memref<1x4x256xf32, #tpu.memory_space<vmem>>, vector<1x4x256xf32>
    %3 = vector.shape_cast %2 : vector<1x4x256xf32> to vector<4x256xf32>
    %c0_5 = arith.constant 0 : index
    %c0_6 = arith.constant 0 : index
    %4 = vector.load %arg4[%c0_5, %c0_6] : memref<32x4xf32, #tpu.memory_space<vmem>>, vector<32x4xf32>
    %cst = arith.constant dense<0.000000e+00> : vector<32x256xf32>
    %5 = tpu.matmul %4, %1, %cst {dimension_numbers = #tpu.dot_dimension_numbers<[1], [0], [0], [1], [0, 0, 1, 1], [], []>} : vector<32x4xf32>, vector<4x256xf32>, vector<32x256xf32> -> vector<32x256xf32>
    %c0_7 = arith.constant 0 : index
    %c0_8 = arith.constant 0 : index
    %6 = vector.load %arg5[%c0_7, %c0_8] : memref<32x1xf32, #tpu.memory_space<vmem>>, vector<32x1xf32>
    %7 = vector.broadcast %6 : vector<32x1xf32> to vector<32x256xf32>
    %8 = arith.addf %5, %7 : vector<32x256xf32>
    %c0_9 = arith.constant 0 : index
    %c0_10 = arith.constant 0 : index
    %9 = vector.load %arg6[%c0_9, %c0_10] : memref<32x4xf32, #tpu.memory_space<vmem>>, vector<32x4xf32>
    %cst_11 = arith.constant dense<0.000000e+00> : vector<32x256xf32>
    %10 = tpu.matmul %9, %3, %cst_11 {dimension_numbers = #tpu.dot_dimension_numbers<[1], [0], [0], [1], [0, 0, 1, 1], [], []>} : vector<32x4xf32>, vector<4x256xf32>, vector<32x256xf32> -> vector<32x256xf32>
    %c0_12 = arith.constant 0 : index
    %c0_13 = arith.constant 0 : index
    %11 = vector.load %arg7[%c0_12, %c0_13] : memref<32x1xf32, #tpu.memory_space<vmem>>, vector<32x1xf32>
    %12 = vector.broadcast %11 : vector<32x1xf32> to vector<32x256xf32>
    %13 = arith.addf %10, %12 : vector<32x256xf32>
    %14 = arith.addf %8, %13 : vector<32x256xf32>
    %cst_14 = arith.constant 0.000000e+00 : f32
    %15 = vector.broadcast %cst_14 : f32 to vector<32x256xf32>
    %16 = arith.maximumf %14, %15 : vector<32x256xf32>
    %c0_15 = arith.constant 0 : index
    %c0_16 = arith.constant 0 : index
    %17 = vector.load %arg8[%c0_15, %c0_16] : memref<1x32xf32, #tpu.memory_space<vmem>>, vector<1x32xf32>
    %cst_17 = arith.constant dense<0.000000e+00> : vector<1x256xf32>
    %18 = tpu.matmul %17, %16, %cst_17 {dimension_numbers = #tpu.dot_dimension_numbers<[1], [0], [0], [1], [0, 0, 1, 1], [], []>} : vector<1x32xf32>, vector<32x256xf32>, vector<1x256xf32> -> vector<1x256xf32>
    %c0_18 = arith.constant 0 : index
    %c0_19 = arith.constant 0 : index
    %19 = vector.load %arg9[%c0_18, %c0_19] : memref<1x1xf32, #tpu.memory_space<vmem>>, vector<1x1xf32>
    %20 = vector.broadcast %19 : vector<1x1xf32> to vector<1x256xf32>
    %21 = arith.addf %18, %20 : vector<1x256xf32>
    %22 = arith.negf %21 : vector<1x256xf32>
    %23 = math.exp %22 : vector<1x256xf32>
    %cst_20 = arith.constant 1.000000e+00 : f32
    %24 = vector.broadcast %cst_20 : f32 to vector<1x256xf32>
    %25 = arith.addf %24, %23 : vector<1x256xf32>
    %26 = arith.divf %24, %25 : vector<1x256xf32>
    %27 = vector.broadcast %26 : vector<1x256xf32> to vector<4x256xf32>
    %28 = arith.mulf %3, %27 : vector<4x256xf32>
    %c0_21 = arith.constant 0 : index
    %c0_22 = arith.constant 0 : index
    %c0_23 = arith.constant 0 : index
    %29 = vector.load %arg10[%c0_21, %c0_22, %c0_23] : memref<1x4x256xf32, #tpu.memory_space<vmem>>, vector<1x4x256xf32>
    %30 = vector.shape_cast %29 : vector<1x4x256xf32> to vector<4x256xf32>
    %31 = vector.shape_cast %28 : vector<4x256xf32> to vector<1x4x256xf32>
    tpu.vector_store %arg10[%c0_21, %c0_22, %c0_23], %31 {strides = array<i32>} : memref<1x4x256xf32, #tpu.memory_space<vmem>>, vector<1x4x256xf32>,
    return
  }
  func.func @transform_0(%arg0: i32, %arg1: i32) -> (i32, i32, i32) {
    %c0_i32 = arith.constant 0 : i32
    %c0_i32_0 = arith.constant 0 : i32
    return %arg0, %c0_i32, %arg1 : i32, i32, i32
  }
  func.func @transform_1(%arg0: i32, %arg1: i32) -> (i32, i32, i32) {
    %c0_i32 = arith.constant 0 : i32
    %c0_i32_0 = arith.constant 0 : i32
    return %arg0, %c0_i32, %arg1 : i32, i32, i32
  }
  func.func @transform_2(%arg0: i32, %arg1: i32) -> (i32, i32) {
    %c0_i32 = arith.constant 0 : i32
    %c0_i32_0 = arith.constant 0 : i32
    %c0_i32_1 = arith.constant 0 : i32
    return %c0_i32, %c0_i32_0 : i32, i32
  }
  func.func @transform_3(%arg0: i32, %arg1: i32) -> (i32, i32) {
    %c0_i32 = arith.constant 0 : i32
    %c0_i32_0 = arith.constant 0 : i32
    %c0_i32_1 = arith.constant 0 : i32
    return %c0_i32, %c0_i32_0 : i32, i32
  }
  func.func @transform_4(%arg0: i32, %arg1: i32) -> (i32, i32) {
    %c0_i32 = arith.constant 0 : i32
    %c0_i32_0 = arith.constant 0 : i32
    %c0_i32_1 = arith.constant 0 : i32
    return %c0_i32, %c0_i32_0 : i32, i32
  }
  func.func @transform_5(%arg0: i32, %arg1: i32) -> (i32, i32) {
    %c0_i32 = arith.constant 0 : i32
    %c0_i32_0 = arith.constant 0 : i32
    %c0_i32_1 = arith.constant 0 : i32
    return %c0_i32, %c0_i32_0 : i32, i32
  }
  func.func @transform_6(%arg0: i32, %arg1: i32) -> (i32, i32) {
    %c0_i32 = arith.constant 0 : i32
    %c0_i32_0 = arith.constant 0 : i32
    %c0_i32_1 = arith.constant 0 : i32
    return %c0_i32, %c0_i32_0 : i32, i32
  }
  func.func @transform_7(%arg0: i32, %arg1: i32) -> (i32, i32) {
    %c0_i32 = arith.constant 0 : i32
    %c0_i32_0 = arith.constant 0 : i32
    %c0_i32_1 = arith.constant 0 : i32
    return %c0_i32, %c0_i32_0 : i32, i32
  }
  func.func @transform_8(%arg0: i32, %arg1: i32) -> (i32, i32, i32) {
    %c0_i32 = arith.constant 0 : i32
    %c0_i32_0 = arith.constant 0 : i32
    return %arg0, %c0_i32, %arg1 : i32, i32, i32
  }
}

</mosaic_0001>

<bundles_post_ra>
// kernel: attention_block.1
= control target key start
LH: loop header
LB: loop body
LE: loop exit
PB: predicated region body
PF: predicated region fallthrough
CT: control target
= control target key end

     0   :  { %s1065_s29 = smov 0   ;;  %s1067_s30 = smov 0   ;;  %s1171_s0 = inlined_call_operand.vmem [shape: f32[2,4,256], index: 0, kind: input, shape index: {}]   ;;  %s1172_s1 = inlined_call_operand.vmem [shape: f32[2,4,256], index: 1, kind: input, shape index: {}]   ;;  %s1173_s2 = inlined_call_operand.vmem [shape: f32[32,4], index: 2, kind: input, shape index: {}]   ;;  %s1174_s3 = inlined_call_operand.vmem [shape: f32[32,1], index: 3, kind: input, shape index: {}]   ;;  %s1175_s4 = inlined_call_operand.vmem [shape: f32[32,4], index: 4, kind: input, shape index: {}]   ;;  %s1176_s5 = inlined_call_operand.vmem [shape: f32[32,1], index: 5, kind: input, shape index: {}]   ;;  %s1177_s6 = inlined_call_operand.vmem [shape: f32[1,32], index: 6, kind: input, shape index: {}]   ;;  %s1178_s7 = inlined_call_operand.<no memory space> [shape: f32[1,1], index: 7, kind: input, shape index: {}]   ;;  %s1179_s8 = inlined_call_operand.vmem [shape: f32[2,4,256], index: 8, kind: output, shape index: {}]  }
   0x1   :  { %v13_v0 = vstv %s1178_s7  ;;  %s1069_s9 = smov 0  }
   0x2   :  { %14 = vst [vmem:[#allocation2] sm:$0x1] %v13_v0 }
   0x3 LB: > { %s32_s7 = sadd.s32 1, %s1009_s30  ;;  %p894_p0 = scmp.ge.s32.totalorder %s1013_s9, 1  ;;  %s1013_s9 = sphi %s1069_s9, %s20_s9   ;;  %s1009_s30 = sphi %s1067_s30, %s1181_s30   ;;  %s1005_s29 = sphi %s1065_s29, %s1180_s29  }
   0x4   : > { %p34_p1 = scmp.ge.s32.totalorder %s32_s7, 2  ;;  %p302_p2 = scmp.lt.s32.totalorder %s1013_s9, 3 }
   0x6   : > { %s1183_s7 = smov (%p34_p1, %s32_s7), 0  ;;  %p303_p3 = pnand %p894_p0, %p302_p2 }
   0x7   : > { %p354_p4 = scmp.lt.s32.totalorder (!%p303_p3), %s1005_s29, 1  ;;  %v1015_v1 = vmov (!%p303_p3), 0.0   ;;  %v1016_v2 = vmov (!%p303_p3), 0   ;;  %v389_v3 = vld [vmem:[%s1174_s3] sm:$0xff] (!%p303_p3)  ;;  %v390_v5 = vld [vmem:[%s1174_s3 + $0x8] sm:$0xff] (!%p303_p3)  ;;  %vm428_vm0 = vcmask (!%p303_p3), 1043456  }
   0x8   : > { %306 = sbr.rel (%p303_p3) target bundleno = 510 (0x1fe), region = 52  ;;  %497 = vmatprep.mubr.f32.mxu1 (!%p303_p3), %v1015_v1  ;;  %632 = vmatprep.mubr.f32.mxu0 (!%p303_p3), %v1015_v1  ;;  %v526_v4 = vld [vmem:[%s1176_s5] sm:$0xff] (!%p303_p3)  ;;  %v527_v6 = vld [vmem:[%s1176_s5 + $0x8] sm:$0xff] (!%p303_p3)  ;;  %vm415_vm1 = vcmask (!%p303_p3), 31744   ;;  %v391_v13 = vld [vmem:[%s1174_s3 + $0x10] sm:$0xff] (!%p303_p3)  ;;  %vm684_vm2 = vcmask (!%p303_p3), 261120  }
   0x9   : > { %979 = vset.pattern.permute.xlu0 (!%p303_p3), %v1016_v2  ;;  %980 = vset.pattern.permute.xlu1 (!%p303_p3), %v1016_v2  ;;  %v385_v10 = vld [vmem:[%s1173_s2] sm:$0xff] (!%p303_p3)  ;;  %v392_v14 = vld [vmem:[%s1174_s3 + $0x18] sm:$0xff] (!%p303_p3)  ;;  %v386_v15 = vld [vmem:[%s1173_s2 + $0x8] sm:$0xff] (!%p303_p3) }
   0xa   : > { %395 = vperm.xlu0 (!%p303_p3), %979, %v389_v3   ;;  %532 = vperm.xlu1 (!%p303_p3), %980, %v526_v4   ;;  %v522_v12 = vld [vmem:[%s1175_s4] sm:$0xff] (!%p303_p3)  ;;  %v523_v16 = vld [vmem:[%s1175_s4 + $0x8] sm:$0xff] (!%p303_p3)  ;;  %v528_v17 = vld [vmem:[%s1176_s5 + $0x10] sm:$0xff] (!%p303_p3) }
   0xb   : > { %v529_v18 = vld [vmem:[%s1176_s5 + $0x18] sm:$0xff] (!%p303_p3)  ;;  %v387_v19 = vld [vmem:[%s1173_s2 + $0x10] sm:$0xff] (!%p303_p3)  ;;  %v674_v21 = vld [vmem:[#allocation2] sm:$0x1] (!%p303_p3) }
   0xc   : > { %v524_v20 = vld [vmem:[%s1175_s4 + $0x10] sm:$0xff] (!%p303_p3)  ;;  %v388_v22 = vld [vmem:[%s1173_s2 + $0x18] sm:$0xff] (!%p303_p3) }
   0xd   : > { %v525_v23 = vld [vmem:[%s1175_s4 + $0x18] sm:$0xff] (!%p303_p3) }
   0xe   : > { %400 = vperm.xlu0 (!%p303_p3), %979, %v390_v5   ;;  %537 = vperm.xlu1 (!%p303_p3), %980, %v527_v6  }
   0xf   : > { %s1185_s29 = smov (!%p354_p4, %s1005_s29), 1 }
  0x10   : > { %s1089_s14 = sshll.u32 %s1185_s29, 3 }
  0x11   : > { %s361_s17 = scalar_lea.vmem %s1171_s0, %s1089_s14  ;;  %s371_s24 = scalar_lea.vmem %s1172_s1, %s1089_s14 }
  0x12   : > { %v383_v7 = vld [vmem:[%s361_s17] sm:$0xff]  ;;  %405 = vperm.xlu0 %979, %v391_v13   ;;  %410 = vperm.xlu1 %980, %v392_v14   ;;  %s381_s15 = scalar_lea.vmem %s1179_s8, %s1089_s14 }
  0x13   : > { %v414_v8 = vcombine.high %v383_v7, %v383_v7  ;;  %v1105_v9 = vld [vmem:[%s371_s24] sm:$0xff] }
  0x14   : > { %v551_v11 = vcombine.high %v1105_v9, %v1105_v9 }
  0x15   : > { %901 = vmatprep.subr.msk.mxu1 %vm428_vm0, %v414_v8 }
  0x16   : > { %902 = vmatpush1.msk.msra.mxu1 %vm428_vm0, %v383_v7  ;;  %907 = vmatprep.subr.msk.mxu0 %vm428_vm0, %v551_v11 }
  0x17   : > { %903 = vmatmul.mubr.msk.f32.vlgmr.msra.gmra.mrb[0].mxu1 %vm415_vm1, %v385_v10  ;;  %908 = vmatpush1.msk.msra.mxu0 %vm428_vm0, %v1105_v9 }
  0x18   : > { %503 = vmatprep.mubr.f32.mxu1 %v1015_v1  ;;  %909 = vmatmul.mubr.msk.f32.vlgmr.msra.gmra.mrb[0].mxu0 %vm415_vm1, %v522_v12 }
  0x19   : > { %638 = vmatprep.mubr.f32.mxu0 %v1015_v1  ;;  %542 = vperm.xlu0 %979, %v528_v17  }
  0x1a   : > { %547 = vperm.xlu1 %980, %v529_v18  }
  0x1b   : > { %904 = vmatmul.mubr.msk.f32.gmra.mrb[2].mxu1 %vm415_vm1, %v386_v15 }
  0x1c   : > { %509 = vmatprep.mubr.f32.mxu1 %v1015_v1  ;;  %910 = vmatmul.mubr.msk.f32.gmra.mrb[2].mxu0 %vm415_vm1, %v523_v16 }
  0x1d   : > { %644 = vmatprep.mubr.f32.mxu0 %v1015_v1  ;;  %677 = vperm.xlu0 %979, %v674_v21   ;;  %v673_v21 = vld [vmem:[%s1177_s6] sm:$0x1] }
  0x1f   : > { %905 = vmatmul.mubr.msk.f32.gmra.mrb[4].mxu1 %vm415_vm1, %v387_v19 }
  0x20   : > { %515 = vmatprep.mubr.f32.mxu1 %v1015_v1  ;;  %911 = vmatmul.mubr.msk.f32.gmra.mrb[4].mxu0 %vm415_vm1, %v524_v20 }
  0x21   : > { %650 = vmatprep.mubr.f32.mxu0 %v1015_v1 }
  0x23   : > { %906 = vmatmul.mubr.msk.f32.gmra.mrb[6].mxu1 %vm415_vm1, %v388_v22  ;;  %v680_v22 = vlaneseq }
  0x24   : > { %912 = vmatmul.mubr.msk.f32.gmra.mrb[6].mxu0 %vm415_vm1, %v525_v23  ;;  %752 = vmatprep.mubr.f32.mxu1 %v1015_v1 }
  0x25   : > { %v681_v23 = vshrl.u32 %v680_v22, 7 }
  0x89   : > { %v396_v24 = vpop.permute.xlu0 %395  ;;  %v533_v25 = vpop.permute.xlu1 %532 }
  0x8d   : > { %v401_v26 = vpop.permute.xlu0 %400  ;;  %v538_v31 = vpop.permute.xlu1 %537 }
  0x91   : > { %v406_v35 = vpop.permute.xlu0 %405  ;;  %v411_v46 = vpop.permute.xlu1 %410 }
  0x98   : > { %v543_v53 = vpop.permute.xlu0 %542 }
  0x99   : > { %v548_v5 = vpop.permute.xlu1 %547 }
  0xea   : > { %v499_v27 = vpop.f32.mrb[0].mxu1 }
  0xeb   : > { %v500_v28 = vadd.f32 %v499_v27, %v396_v24  ;;  %v501_v29 = vpop.f32.mrb[1].mxu1  ;;  %v634_v30 = vpop.f32.mrb[0].mxu0 }
  0xec   : > { %v502_v32 = vadd.f32 %v501_v29, %v396_v24  ;;  %v636_v33 = vpop.f32.mrb[1].mxu0  ;;  %v682_v24 = vsub.s32 0, %v681_v23 }
  0xed   : > { %v930_v34 = vadd.f32 %v533_v25, %v500_v28 }
  0xee   : > { %v505_v36 = vpop.f32.mrb[2].mxu1  ;;  %v933_v37 = vadd.f32 %v533_v25, %v502_v32  ;;  %v678_v25 = vpop.permute.xlu0 %677 }
  0xef   : > { %v931_v38 = vadd.f32 %v930_v34, %v634_v30  ;;  %v506_v39 = vadd.f32 %v505_v36, %v401_v26  ;;  %v507_v40 = vpop.f32.mrb[3].mxu1  ;;  %v640_v41 = vpop.f32.mrb[2].mxu0 }
  0xf0   : > { %v934_v42 = vadd.f32 %v933_v37, %v636_v33  ;;  %v508_v43 = vadd.f32 %v507_v40, %v401_v26  ;;  %v642_v44 = vpop.f32.mrb[3].mxu0  ;;  %v683_v26 = vrot.slane %v678_v25, %v682_v24 }
  0xf1   : > { %v936_v45 = vadd.f32 %v538_v31, %v506_v39  ;;  %v665_v57 = vmax.f32 %v931_v38, 0.0 }
  0xf2   : > { %v511_v47 = vpop.f32.mrb[4].mxu1  ;;  %v939_v48 = vadd.f32 %v538_v31, %v508_v43  ;;  %v666_v60 = vmax.f32 %v934_v42, 0.0 }
  0xf3   : > { %v937_v49 = vadd.f32 %v936_v45, %v640_v41  ;;  %v512_v50 = vadd.f32 %v511_v47, %v406_v35  ;;  %v513_v51 = vpop.f32.mrb[5].mxu1  ;;  %v646_v52 = vpop.f32.mrb[4].mxu0 }
  0xf4   : > { %v940_v54 = vadd.f32 %v939_v48, %v642_v44  ;;  %v514_v55 = vadd.f32 %v513_v51, %v406_v35  ;;  %v648_v56 = vpop.f32.mrb[5].mxu0 }
  0xf5   : > { %v667_v58 = vmax.f32 %v937_v49, 0.0  ;;  %v942_v59 = vadd.f32 %v543_v53, %v512_v50 }
  0xf6   : > { %v668_v61 = vmax.f32 %v940_v54, 0.0  ;;  %v517_v62 = vpop.f32.mrb[6].mxu1  ;;  %v945_v63 = vadd.f32 %v543_v53, %v514_v55 }
  0xf7   : > { %v923_v0 = vpack.c.bf16 %v667_v58, %v665_v57  ;;  %v943_v1 = vadd.f32 %v942_v59, %v646_v52  ;;  %v518_v2 = vadd.f32 %v517_v62, %v411_v46  ;;  %v519_v3 = vpop.f32.mrb[7].mxu1  ;;  %v652_v4 = vpop.f32.mrb[6].mxu0 }
  0xf8   : > { %v921_v6 = vpack.c.bf16 %v668_v61, %v666_v60  ;;  %v946_v7 = vadd.f32 %v945_v63, %v648_v56  ;;  %v520_v8 = vadd.f32 %v519_v3, %v411_v46  ;;  %v654_v10 = vpop.f32.mrb[7].mxu0 }
  0xf9   : > { %v948_v11 = vadd.f32 %v548_v5, %v518_v2  ;;  %v669_v15 = vmax.f32 %v943_v1, 0.0 }
  0xfa   : > { %v951_v12 = vadd.f32 %v548_v5, %v520_v8  ;;  %922 = vmatprep.subr.bf16.mxu1 %v921_v6  ;;  %v670_v17 = vmax.f32 %v946_v7, 0.0 }
  0xfb   : > { %v949_v13 = vadd.f32 %v948_v11, %v652_v4  ;;  %924 = vmatpush1.bf16.msra.mxu1 %v923_v0 }
  0xfc   : > { %v952_v14 = vadd.f32 %v951_v12, %v654_v10 }
  0xfd   : > { %v671_v16 = vmax.f32 %v949_v13, 0.0 }
  0xfe   : > { %v672_v18 = vmax.f32 %v952_v14, 0.0 }
  0xff   : > { %v927_v19 = vpack.c.bf16 %v671_v16, %v669_v15 }
 0x100   : > { %v925_v20 = vpack.c.bf16 %v672_v18, %v670_v17 }
 0x102   : > { %926 = vmatprep.subr.bf16.mxu1 %v925_v20 }
 0x103   : > { %928 = vmatpush1.bf16.msra.mxu1 %v927_v19 }
 0x106   : > { %913 = vmatmul.mubr.msk.f32.vlgmr.msra.gmra.mrb[8].mxu1 %vm684_vm2, %v673_v21 }
 0x1d9   : > { %v754_v27 = vpop.f32.mrb[8].mxu1 }
 0x1da   : > { %v755_v28 = vadd.f32 %v754_v27, %v683_v26  ;;  %v756_v29 = vpop.f32.mrb[9].mxu1 }
 0x1db   : > { %v757_v30 = vadd.f32 %v756_v29, %v683_v26 }
 0x1dc   : > { %v914_v31 = vmul.f32 -1.442695, %v755_v28 }
 0x1dd   : > { %v915_v32 = vmul.f32 -1.442695, %v757_v30 }
 0x1de   : > { %983 = vpow2.f32 %v914_v31 }
 0x1df   : > { %985 = vpow2.f32 %v915_v32 }
 0x1e8   : > { %v984_v33 = vpop.eup %983 }
 0x1e9   : > { %v986_v34 = vpop.eup %985  ;;  %v765_v35 = vadd.f32 1.0, %v984_v33 }
 0x1ea   : > { %v766_v36 = vadd.f32 1.0, %v986_v34 }
 0x1eb   : > { %987 = vrcp.f32 %v765_v35 }
 0x1ec   : > { %989 = vrcp.f32 %v766_v36 }
 0x1f5   : > { %v988_v37 = vpop.eup %987 }
 0x1f6   : > { %v990_v38 = vpop.eup %989  ;;  %v774_v39 = vrot.slane %v988_v37, %v682_v24 }
 0x1f7   : > { %v778_v40 = vrot.slane %v990_v38, %v682_v24 }
 0x1f9   : > { %v781_v41 = vcombine.low %v774_v39, %v778_v40 }
 0x1fb   : > { %v783_v42 = vmul.f32 %v781_v41, %v1105_v9 }
 0x1fd   : > { %784 = vst [vmem:[%s381_s15] sm:$0xff] %v783_v42 }
 0x1fe PF: > { %s20_s9 = sadd.s32 1, %s1013_s9   ;;  %s1180_s29 = smov %s1009_s30 }
 0x1ff   : > { %p17_p5 = scmp.ge.s32.totalorder %s20_s9, 4   ;;  %s1181_s30 = smov %s1183_s7 }
 0x201   :  { %19 = sbr.rel (!%p17_p5) target bundleno = 3 (0x3), region = 85 }

</bundles_post_ra>
